<compile_context>
chip_gen: v5e
topology: v5e:2x2
jax: 0.10.0
libtpu: 0.0.40
codegen_flags: <defaults>
</compile_context>

<pallas_src>
import functools

import jax
import jax.numpy as jnp
import numpy as np
from jax.experimental import pallas as pl
from jax.experimental.pallas import tpu as pltpu

_LANE = 128


# ----------------------------------------------------------------------------
# Pallas kernel: BatchNorm1d (training-mode batch statistics, biased variance)
# Each grid step sees one lane-dense feature tile: x (N, TILE_C),
# gamma/beta (1, TILE_C).  The N-reduction is fully local to the tile.
# ----------------------------------------------------------------------------
def _bn1d_kernel(x_ref, gamma_ref, beta_ref, o_ref, *, eps, inv_n):
    x = x_ref[...]
    xf = x if x.dtype == jnp.float32 else x.astype(jnp.float32)

    # Per-feature batch statistics (reduce over batch axis N), kept as
    # (1, TILE_C) so broadcasts are hoisted / computed once per tile.
    mean = jnp.sum(xf, axis=0, keepdims=True) * inv_n            # (1, TILE_C)
    diff = xf - mean                                             # (N, TILE_C)
    var = jnp.sum(diff * diff, axis=0, keepdims=True) * inv_n    # biased var

    # Fold the affine: y = x * scale + bias  (2 VALU ops / element).
    scale = jax.lax.rsqrt(var + eps) * gamma_ref[...]            # (1, TILE_C)
    bias = beta_ref[...] - mean * scale                          # (1, TILE_C)
    o_ref[...] = (xf * scale + bias).astype(o_ref.dtype)


def _pick_tile_c(n, c_pad, vmem_budget_bytes):
    """Largest multiple of 128 dividing c_pad whose double-buffered in+out
    tiles (f32) fit the budget.  Conservative enough for v7x's 64 MiB VMEM."""
    # 2 input buffers + 2 output buffers of (n, tile_c) f32.
    bytes_per_col = n * 4 * 4
    max_tile = max(_LANE, (vmem_budget_bytes // max(bytes_per_col, 1))
                   // _LANE * _LANE)
    tile_c = _LANE
    for cand in range(min(c_pad, max_tile), _LANE - 1, -_LANE):
        if c_pad % cand == 0:
            tile_c = cand
            break
    return tile_c


def etf_classifier_forward(x, gamma, beta, eps=1e-5,
                           vmem_budget_bytes=16 * 1024 * 1024):
    """Forward of ETFClassifier: y = BatchNorm1d(x) with batch statistics.

    x:     (N, C)
    gamma: (C,)  (BN weight, init = 1)
    beta:  (C,)  (BN bias,   init = 0)
    """
    n, c = x.shape

    # Pad feature axis up to a multiple of 128 so every tile is lane-dense.
    # Padded columns: mean=0, var=0 -> inv_std = 1/sqrt(eps) (finite); they
    # are sliced off before returning, so they never affect real outputs.
    c_pad = pl.cdiv(c, _LANE) * _LANE
    gamma_f = gamma.astype(jnp.float32)
    beta_f = beta.astype(jnp.float32)
    if c_pad != c:
        x_p = jnp.pad(x, ((0, 0), (0, c_pad - c)))
        gamma_p = jnp.pad(gamma_f, (0, c_pad - c), constant_values=1.0)
        beta_p = jnp.pad(beta_f, (0, c_pad - c))
    else:
        x_p, gamma_p, beta_p = x, gamma_f, beta_f
    gamma2 = gamma_p.reshape(1, c_pad)
    beta2 = beta_p.reshape(1, c_pad)

    tile_c = _pick_tile_c(n, c_pad, vmem_budget_bytes)
    # TODO(synk): for very large N where even (N, 128) f32 tiles exceed the
    # VMEM budget, switch to a two-pass structure (sum / sum-of-squares
    # accumulation over an "arbitrary" N grid axis, then apply scale/bias).
    grid = (c_pad // tile_c,)

    kernel = functools.partial(_bn1d_kernel, eps=eps, inv_n=1.0 / n)
    y_p = pl.pallas_call(
        kernel,
        out_shape=jax.ShapeDtypeStruct((n, c_pad), x.dtype),
        grid=grid,
        in_specs=[
            pl.BlockSpec((n, tile_c), lambda j: (0, j)),
            pl.BlockSpec((1, tile_c), lambda j: (0, j)),
            pl.BlockSpec((1, tile_c), lambda j: (0, j)),
        ],
        out_specs=pl.BlockSpec((n, tile_c), lambda j: (0, j)),
        compiler_params=pltpu.CompilerParams(
            dimension_semantics=("parallel",),
        ),
    )(x_p, gamma2, beta2)

    return y_p[:, :c] if c_pad != c else y_p


# ----------------------------------------------------------------------------
# Deterministic parameter construction (mirrors ETFClassifier.__init__)
# ----------------------------------------------------------------------------
def build_etf_params(key, num_features, num_classes):
    # Random orthonormal P (num_features, num_classes) via QR.
    a = jax.random.uniform(key, (num_features, num_classes), dtype=jnp.float32)
    P, _ = jnp.linalg.qr(a)
    I = jnp.eye(num_classes, dtype=jnp.float32)
    one = jnp.ones((num_classes, num_classes), dtype=jnp.float32)
    M = np.sqrt(float(num_classes) / (num_classes - 1)) * (
        P @ (I - one / num_classes)
    )  # ori_M -- stored but unused in forward (kept for parity with the module)

    # BatchNorm1d affine params (PyTorch init: weight=1, bias=0).
    gamma = jnp.ones((num_features,), dtype=jnp.float32)
    beta = jnp.zeros((num_features,), dtype=jnp.float32)
    return M, gamma, beta


if __name__ == "__main__":
    num_features = 32   # hidden
    num_classes = 8
    batch = 8

    key = jax.random.PRNGKey(0)
    k_param, k_x = jax.random.split(key)

    ori_M, gamma, beta = build_etf_params(k_param, num_features, num_classes)
    x = jax.random.normal(k_x, (batch, num_features), dtype=jnp.float32)

    y = etf_classifier_forward(x, gamma, beta)
    y = jax.block_until_ready(y)

    # Reference check against plain-JAX BatchNorm1d (training-mode stats).
    mean = jnp.mean(x, axis=0, keepdims=True)
    var = jnp.mean((x - mean) ** 2, axis=0, keepdims=True)
    y_ref = (x - mean) / jnp.sqrt(var + 1e-5) * gamma[None, :] + beta[None, :]
    assert jnp.allclose(y, y_ref, atol=1e-5, rtol=1e-5), float(
        jnp.max(jnp.abs(y - y_ref))
    )

    print("KERNEL_OK")
</pallas_src>

<mosaic_0001>
module attributes {stable_mosaic.version = 11 : i64} {
  func.func @_bn1d_kernel(%arg0: i32, %arg1: memref<8x128xf32, #tpu.memory_space<vmem>>, %arg2: memref<1x128xf32, #tpu.memory_space<vmem>>, %arg3: memref<1x128xf32, #tpu.memory_space<vmem>>, %arg4: memref<8x128xf32, #tpu.memory_space<vmem>>) attributes {dimension_semantics = [#tpu.dimension_semantics<parallel>], iteration_bounds = array<i64: 1>, scalar_prefetch = 0 : i64, scratch_operands = 0 : i64, tpu.core_type = #tpu.core_type<tc>, window_params = [{transform_indices = @transform_0, window_bounds = array<i64: 8, 128>}, {transform_indices = @transform_1, window_bounds = array<i64: 1, 128>}, {transform_indices = @transform_2, window_bounds = array<i64: 1, 128>}, {transform_indices = @transform_3, window_bounds = array<i64: 8, 128>}]} {
    %c0 = arith.constant 0 : index
    %c0_0 = arith.constant 0 : index
    %0 = vector.load %arg1[%c0, %c0_0] : memref<8x128xf32, #tpu.memory_space<vmem>>, vector<8x128xf32>
    %cst = arith.constant dense<0.000000e+00> : vector<128xf32>
    %1 = vector.multi_reduction <add>, %0, %cst [0] : vector<8x128xf32> to vector<128xf32>
    %2 = vector.shape_cast %1 : vector<128xf32> to vector<1x128xf32>
    %cst_1 = arith.constant 1.250000e-01 : f32
    %3 = vector.broadcast %cst_1 : f32 to vector<1x128xf32>
    %4 = arith.mulf %2, %3 : vector<1x128xf32>
    %5 = vector.broadcast %4 : vector<1x128xf32> to vector<8x128xf32>
    %6 = arith.subf %0, %5 : vector<8x128xf32>
    %7 = arith.mulf %6, %6 : vector<8x128xf32>
    %cst_2 = arith.constant dense<0.000000e+00> : vector<128xf32>
    %8 = vector.multi_reduction <add>, %7, %cst_2 [0] : vector<8x128xf32> to vector<128xf32>
    %9 = vector.shape_cast %8 : vector<128xf32> to vector<1x128xf32>
    %cst_3 = arith.constant 1.250000e-01 : f32
    %10 = vector.broadcast %cst_3 : f32 to vector<1x128xf32>
    %11 = arith.mulf %9, %10 : vector<1x128xf32>
    %cst_4 = arith.constant 9.99999974E-6 : f32
    %12 = vector.broadcast %cst_4 : f32 to vector<1x128xf32>
    %13 = arith.addf %11, %12 : vector<1x128xf32>
    %14 = math.rsqrt %13 : vector<1x128xf32>
    %c0_5 = arith.constant 0 : index
    %c0_6 = arith.constant 0 : index
    %15 = vector.load %arg2[%c0_5, %c0_6] : memref<1x128xf32, #tpu.memory_space<vmem>>, vector<1x128xf32>
    %16 = arith.mulf %14, %15 : vector<1x128xf32>
    %c0_7 = arith.constant 0 : index
    %c0_8 = arith.constant 0 : index
    %17 = vector.load %arg3[%c0_7, %c0_8] : memref<1x128xf32, #tpu.memory_space<vmem>>, vector<1x128xf32>
    %18 = arith.mulf %4, %16 : vector<1x128xf32>
    %19 = arith.subf %17, %18 : vector<1x128xf32>
    %20 = vector.broadcast %16 : vector<1x128xf32> to vector<8x128xf32>
    %21 = arith.mulf %0, %20 : vector<8x128xf32>
    %22 = vector.broadcast %19 : vector<1x128xf32> to vector<8x128xf32>
    %23 = arith.addf %21, %22 : vector<8x128xf32>
    %c0_9 = arith.constant 0 : index
    %c0_10 = arith.constant 0 : index
    %24 = vector.load %arg4[%c0_9, %c0_10] : memref<8x128xf32, #tpu.memory_space<vmem>>, vector<8x128xf32>
    tpu.vector_store %arg4[%c0_9, %c0_10], %23 {strides = array<i32>} : memref<8x128xf32, #tpu.memory_space<vmem>>, vector<8x128xf32>,
    return
  }
  func.func @transform_0(%arg0: i32) -> (i32, i32) {
    %c0_i32 = arith.constant 0 : i32
    %c0_i32_0 = arith.constant 0 : i32
    return %c0_i32, %arg0 : i32, i32
  }
  func.func @transform_1(%arg0: i32) -> (i32, i32) {
    %c0_i32 = arith.constant 0 : i32
    %c0_i32_0 = arith.constant 0 : i32
    return %c0_i32, %arg0 : i32, i32
  }
  func.func @transform_2(%arg0: i32) -> (i32, i32) {
    %c0_i32 = arith.constant 0 : i32
    %c0_i32_0 = arith.constant 0 : i32
    return %c0_i32, %arg0 : i32, i32
  }
  func.func @transform_3(%arg0: i32) -> (i32, i32) {
    %c0_i32 = arith.constant 0 : i32
    %c0_i32_0 = arith.constant 0 : i32
    return %c0_i32, %arg0 : i32, i32
  }
}

</mosaic_0001>

<bundles_post_ra>
// kernel: tpu_custom_call.1
= control target key start
LH: loop header
LB: loop body
LE: loop exit
PB: predicated region body
PF: predicated region fallthrough
CT: control target
= control target key end

     0   :  { %8 = vsyncpa [#allocation3], 0  ;;  %s219_s0 = inlined_call_operand.hbm [shape: f32[8,128], index: 0, kind: input, shape index: {}]   ;;  %s220_s1 = inlined_call_operand.hbm [shape: f32[1,128], index: 1, kind: input, shape index: {}]   ;;  %s221_s2 = inlined_call_operand.vmem [shape: f32[1,128], index: 2, kind: input, shape index: {}]   ;;  %s222_s3 = inlined_call_operand.hbm [shape: f32[8,128], index: 3, kind: output, shape index: {}]  }
   0x1   :  { %9 = vsyncpa [#allocation6], 0 }
   0x2   :  { %10 = vsyncpa [#allocation4], 0  ;;  %s16_s14 = sshll.u32 %s219_s0, 4  ;;  %s184_s15 = smov [#allocation2]   ;;  %s17_s14 = int_to_ptr.hbm [resolvable:$true] %s16_s14 }
   0x3   :  { %s18_s16 = sshll.u32 %s184_s15, 4  ;;  %s27_s19 = sshll.u32 %s220_s1, 4  ;;  %s19_s16 = int_to_ptr.vmem [resolvable:$true] %s18_s16  ;;  %s28_s19 = int_to_ptr.hbm [resolvable:$true] %s27_s19 }
   0x4   :  { %21 = dma.hbm_to_vmem [thread:$0]  %s17_s14, 128, %s19_s16, [#allocation3]  }
   0x5   :  { %s185_s20 = smov [#allocation5]  }
   0x6   :  { %s29_s21 = sshll.u32 %s185_s20, 4  ;;  %s30_s21 = int_to_ptr.vmem [resolvable:$true] %s29_s21 }
   0x7   :  { %32 = dma.hbm_to_vmem [thread:$0]  %s28_s19, 16, %s30_s21, [#allocation6]  }
   0x8   :  { %178 = dma.done.wait [#allocation3], 128  }
   0x9   :  { %179 = vsyncadd [#allocation3], 4294967168 }
   0xa   :  { %180 = dma.done.wait [#allocation6], 16  }
   0xb   :  { %181 = vsyncadd [#allocation6], 4294967280  ;;  %v43_v0 = vld [vmem:[#allocation2] sm:$0xff]  ;;  %v71_v24 = vld [vmem:[#allocation5] sm:$0x1]  ;;  %s186_s22 = smov [#allocation7]  }
   0xc   :  { %v44_v1 = vrot.slane %v43_v0, 4  ;;  %v73_v27 = vld [vmem:[%s221_s2] sm:$0x1]  ;;  %s88_s23 = sshll.u32 %s186_s22, 4  ;;  %s90_s26 = sshll.u32 %s222_s3, 4  ;;  %s89_s23 = int_to_ptr.vmem [resolvable:$true] %s88_s23  ;;  %s91_s26 = int_to_ptr.hbm [resolvable:$true] %s90_s26 }
   0xe   :  { %v45_v2 = vadd.f32 %v44_v1, %v43_v0 }
  0x10   :  { %v46_v3 = vrot.slane %v45_v2, 2 }
  0x12   :  { %v47_v4 = vadd.f32 %v46_v3, %v45_v2 }
  0x14   :  { %v48_v5 = vrot.slane %v47_v4, 1 }
  0x16   :  { %v49_v6 = vadd.f32 %v48_v5, %v47_v4 }
  0x18   :  { %v50_v7 = vmul.f32 0.125, %v49_v6 }
  0x1a   :  { %v51_v8 = vsub.f32 %v43_v0, %v50_v7 }
  0x1c   :  { %v52_v9 = vmul.f32 %v51_v8, %v51_v8 }
  0x1e   :  { %v53_v10 = vrot.slane %v52_v9, 4 }
  0x20   :  { %v54_v11 = vadd.f32 %v53_v10, %v52_v9 }
  0x22   :  { %v55_v12 = vrot.slane %v54_v11, 2 }
  0x24   :  { %v56_v13 = vadd.f32 %v55_v12, %v54_v11 }
  0x26   :  { %v57_v14 = vrot.slane %v56_v13, 1 }
  0x28   :  { %v58_v15 = vadd.f32 %v57_v14, %v56_v13 }
  0x2a   :  { %v59_v16 = vmul.f32 0.125, %v58_v15 }
  0x2c   :  { %v60_v17 = vadd.f32 1e-05, %v59_v16 }
  0x2e   :  { %104 = vrsqrt.f32 %v60_v17  ;;  %vm67_vm0 = vweird.f32 %v60_v17 }
  0x34   :  { %v105_v18 = vpop.eup %104 }
  0x35   :  { %v62_v19 = vmul.f32 %v105_v18, %v60_v17  ;;  %vm68_vm1 = vweird.f32 %v105_v18 }
  0x36   :  { %vm69_vm2 = vmor %vm67_vm0, %vm68_vm1 }
  0x37   :  { %v63_v20 = vmul.f32 %v105_v18, %v62_v19 }
  0x39   :  { %v64_v21 = vmul.f32 0.5, %v63_v20 }
  0x3b   :  { %v65_v22 = vsub.f32 1.5, %v64_v21 }
  0x3d   :  { %v66_v23 = vmul.f32 %v105_v18, %v65_v22 }
  0x3f   :  { %v70_v25 = vsel %vm69_vm2, %v105_v18, %v66_v23 }
  0x40   :  { %v72_v26 = vmul.f32 %v71_v24, %v70_v25 }
  0x42   :  { %v74_v28 = vmul.f32 %v72_v26, %v50_v7  ;;  %v76_v29 = vperm.slane %v72_v26, 0 }
  0x44   :  { %v75_v30 = vsub.f32 %v73_v27, %v74_v28  ;;  %v77_v31 = vmul.f32 %v76_v29, %v43_v0 }
  0x46   :  { %v79_v32 = vperm.slane %v75_v30, 0 }
  0x48   :  { %v81_v33 = vadd.f32 %v79_v32, %v77_v31 }
  0x4a   :  { %82 = vst [vmem:[#allocation7] sm:$0xff] %v81_v33 }
  0x4b   :  { %93 = dma.vmem_to_hbm [thread:$0]  %s89_s23, 128, %s91_s26, [#allocation4]  }
  0x4c   :  { %182 = dma.done.wait [#allocation4], 128  }
  0x4d   :  { %183 = vsyncadd [#allocation4], 4294967168 }
  0x4e   :  { %98 = vsyncpa [#allocation3], 1 }
  0x4f   :  { %99 = vsyncpa [#allocation6], 1 }
  0x50   :  { %100 = vsyncpa [#allocation4], 1 }

</bundles_post_ra>
